<compile_context>
chip_gen: v7x
topology: tpu7x:2x2x1
jax: 0.10.0
libtpu: 0.0.40
codegen_flags: <defaults>
</compile_context>

<pallas_src>
import functools

import numpy as np

import jax
import jax.numpy as jnp
from jax.experimental import pallas as pl
from jax.experimental.pallas import tpu as pltpu


# ----------------------------------------------------------------------------
# Fused kernel: BN1 -> ReLU -> 1x1 conv (BN2 scale folded) -> +b2 -> ReLU
#               -> 3x3 grouped conv (padding=1) -> + residual
# ----------------------------------------------------------------------------
def _dense_layer_fused_kernel(x_ref, s1_ref, b1_ref, w1b_ref, b2_ref, w2b_ref,
                              o_ref, *, img_h):
    # x_ref  : (R, W*Cin)      R = images_per_block * H rows; (W, Cin) folded into lanes
    # s1/b1  : (1, W*Cin)      BN1 scale / shift, tiled W times
    # w1b    : (W*Cin, W*Cmid) block-diagonal 1x1 weight (BN2 scale folded), bf16
    # b2     : (1, W*Cmid)     BN2 shift, tiled W times
    # w2b    : (3, W*Cmid, W*Cin) banded 3x3 weight per vertical tap ky (x-taps + group
    #                             structure baked into the bands), bf16
    # o_ref  : (R, W*Cin)
    R = x_ref.shape[0]
    xr = x_ref[...]                                                  # (R, W*Cin), f32

    # BN1 + ReLU (f32 VPU math; v5e has no bf16 VALU).
    a = jnp.maximum(xr * s1_ref[...] + b1_ref[...], 0.0)

    # 1x1 conv with BN2 scale pre-folded: single block-diagonal matmul over the
    # lane-folded (W, C) layout.  bf16 operands / f32 accumulation on the MXU, M = R.
    h = jnp.dot(a.astype(jnp.bfloat16), w1b_ref[...],
                preferred_element_type=jnp.float32)                  # (R, W*Cmid)
    h = jnp.maximum(h + b2_ref[...], 0.0)                            # BN2 shift + ReLU

    # 3x3 conv, padding=1.  Vertical halo rows via XLU sublane rolls + border mask:
    # rows with r % H == 0 have no "up" neighbour, rows with r % H == H-1 no "down"
    # neighbour (this also kills the roll wrap-around between images in the block).
    row_in_img = jax.lax.broadcasted_iota(jnp.int32, h.shape, 0) % img_h
    h_up = jnp.where(row_in_img == 0,         0.0, pltpu.roll(h, 1,     axis=0))  # h[r-1]
    h_dn = jnp.where(row_in_img == img_h - 1, 0.0, pltpu.roll(h, R - 1, axis=0))  # h[r+1]

    # Horizontal taps + group block-structure live in w2b's band structure; the three
    # vertical taps are three bf16 MXU dots accumulating into one f32 accumulator
    # (no (R, 3*W*Cmid) concat temporary).
    y = jnp.dot(h_up.astype(jnp.bfloat16), w2b_ref[0],
                preferred_element_type=jnp.float32)                  # ky = 0 (row r-1)
    y = y + jnp.dot(h.astype(jnp.bfloat16), w2b_ref[1],
                    preferred_element_type=jnp.float32)              # ky = 1 (row r)
    y = y + jnp.dot(h_dn.astype(jnp.bfloat16), w2b_ref[2],
                    preferred_element_type=jnp.float32)              # ky = 2 (row r+1)

    o_ref[...] = y + xr                                              # residual add, f32


# ----------------------------------------------------------------------------
# Parameter construction (deterministic, PyTorch-compatible shapes)
# ----------------------------------------------------------------------------
def init_dense_layer_params(key, in_channels, growth_rate, bottleneck, group_3x3):
    cmid = bottleneck * growth_rate
    keys = jax.random.split(key, 10)
    eps = 1e-5  # nn.BatchNorm2d default

    def bn_params(kg, kb, km, kv, c):
        gamma = 1.0 + 0.1 * jax.random.normal(kg, (c,), jnp.float32)
        beta = 0.1 * jax.random.normal(kb, (c,), jnp.float32)
        mean = 0.1 * jax.random.normal(km, (c,), jnp.float32)
        var = jax.random.uniform(kv, (c,), jnp.float32, 0.5, 1.5)
        scale = gamma / jnp.sqrt(var + eps)
        shift = beta - mean * scale
        return scale, shift

    s1, b1 = bn_params(keys[0], keys[1], keys[2], keys[3], in_channels)  # LearnedGroupConv.norm
    s2, b2 = bn_params(keys[4], keys[5], keys[6], keys[7], cmid)         # Conv.norm

    # conv_1 weight: nn.Conv2d(in_channels, cmid, 1, bias=False) -> (cmid, in, 1, 1).
    # The LearnedGroupConv condensation mask is all-ones right after __init__ (no pruning).
    w1 = jax.random.normal(keys[8], (cmid, in_channels, 1, 1), jnp.float32)
    w1 = w1 / jnp.sqrt(float(in_channels))
    w1 = w1 * jnp.ones_like(w1)                       # mask (all ones at construction)
    w1_mat = jnp.transpose(w1[:, :, 0, 0], (1, 0))    # (Cin, Cmid)

    # conv_2 weight: nn.Conv2d(cmid, in_channels, 3, padding=1, groups=G, bias=False)
    ci_g = cmid // group_3x3
    w2 = jax.random.normal(keys[9], (in_channels, ci_g, 3, 3), jnp.float32)
    w2 = w2 / jnp.sqrt(float(ci_g * 9))

    return dict(s1=s1, b1=b1, s2=s2, b2=b2, w1_mat=w1_mat, w2=w2,
                cmid=cmid, group_3x3=group_3x3)


def pack_dense_layer_params(params, H, W):
    """Host-side packing of the kernel-ready (lane-folded, bf16) weight matrices."""
    s1 = np.asarray(params["s1"], np.float32)
    b1 = np.asarray(params["b1"], np.float32)
    s2 = np.asarray(params["s2"], np.float32)
    b2 = np.asarray(params["b2"], np.float32)
    w1_mat = np.asarray(params["w1_mat"], np.float32)    # (Cin, Cmid)
    w2 = np.asarray(params["w2"], np.float32)            # (Cin, Cmid//G, 3, 3)
    Cin, Cmid = w1_mat.shape
    G = params["group_3x3"]
    WCi, WCm = W * Cin, W * Cmid

    # Fold the BN2 scale into the 1x1 weight so the kernel epilogue is just `h + b2`.
    w1s = w1_mat * s2[None, :]

    # Block-diagonal 1x1 weight over the lane-folded (W, C) layout: (W*Cin, W*Cmid).
    w1b = np.zeros((WCi, WCm), np.float32)
    for j in range(W):
        w1b[j * Cin:(j + 1) * Cin, j * Cmid:(j + 1) * Cmid] = w1s

    # Dense (block-diagonal over groups) 3x3 weight; mathematically == the grouped conv.
    ci_g, co_g = Cmid // G, Cin // G
    w2_dense = np.zeros((Cin, Cmid, 3, 3), np.float32)
    for g in range(G):
        w2_dense[g * co_g:(g + 1) * co_g, g * ci_g:(g + 1) * ci_g] = w2[g * co_g:(g + 1) * co_g]

    # Banded 3x3 weight (3, W*Cmid, W*Cin): leading axis = vertical tap ky; per ky the
    # band bakes in the horizontal taps kx = j - jp + 1 and the x-direction zero padding.
    # TODO(synk): for real CondenseNet widths (W*Cmid > one MXU tile, Cin/Cmid >= 128)
    #             switch the 1x1 to a plain (rows, Cin)x(Cin, Cmid) matmul and the 3x3 to
    #             per-group K-tiled matmuls + halo row tiling: w1b is 87.5% zeros and w2b
    #             ~80% zeros here, which is only "free" while W*Cmid <= one MXU tile, and
    #             the quadratic densified weights would not fit v7x's 64 MiB VMEM.
    w2b = np.zeros((3, WCm, WCi), np.float32)
    for ky in range(3):
        for j in range(W):          # input column
            for jp in range(W):     # output column
                kx = j - jp + 1
                if 0 <= kx <= 2:
                    w2b[ky, j * Cmid:(j + 1) * Cmid,
                        jp * Cin:(jp + 1) * Cin] = w2_dense[:, :, ky, kx].T

    return dict(
        s1_row=jnp.asarray(np.tile(s1, W)[None, :], jnp.float32),   # (1, W*Cin)
        b1_row=jnp.asarray(np.tile(b1, W)[None, :], jnp.float32),   # (1, W*Cin)
        b2_row=jnp.asarray(np.tile(b2, W)[None, :], jnp.float32),   # (1, W*Cmid)
        w1b=jnp.asarray(w1b, jnp.bfloat16),                         # (W*Cin, W*Cmid)
        w2b=jnp.asarray(w2b, jnp.bfloat16),                         # (3, W*Cmid, W*Cin)
    )


# ----------------------------------------------------------------------------
# Wrapper (NCHW in / NCHW out)
# ----------------------------------------------------------------------------
def _rows_per_block(n_images, img_h, target_rows=256):
    """Whole images per grid step, aiming for ~target_rows sublane rows per block.

    Real shapes (N*H >= 256) get >=128-row MXU matmuls AND >=2 grid steps (keeps both
    v7x TensorCores busy).  At the toy shape N*H = 16 < 128, so all rows go into a
    single step: per-image steps would drop the matmuls back to M = 8, which wastes far
    more MXU than one idle v7x core here (per review item 1).
    """
    ipb = max(1, min(n_images, max(1, target_rows // img_h)))
    while n_images % ipb:
        ipb -= 1
    return ipb * img_h, n_images // ipb


def dense_layer_forward(x_nchw, packed):
    N, Cin, H, W = x_nchw.shape
    WCi = W * Cin
    WCm = packed["w1b"].shape[1]

    # NHWC, then fold (N*H) into the sublane/M axis and (W, Cin) into the lane axis:
    # (N*H, W*Cin).  The reshape is free on NHWC memory; only the NCHW<->NHWC edge
    # transposes move data — drop them when the surrounding network is channels-last.
    x_rows = jnp.transpose(x_nchw, (0, 2, 3, 1)).astype(jnp.float32).reshape(N * H, WCi)

    block_rows, num_blocks = _rows_per_block(N, H)

    # Lane density: at this toy width W*Cin = 64 (< 128 lanes) the activation loads /
    # stores are 64-lane masked ops.  At real CondenseNet widths the folded lane axis is
    # already >= 128 so the issue disappears; repacking two sublane rows per 128-lane
    # stored row here would need an in-kernel (R,64)->(R/2,128) relayout (VMEM round
    # trip) that costs more than the masked stores it saves at this size.
    # TODO(synk): revisit 128-lane output slab packing if a production shape has W*Cin < 128.
    #
    # NOTE: the weight/scale operands are grid-invariant; with a multi-step grid their
    # default second pipeline buffer is dead VMEM (~70 KiB here, negligible).
    # TODO(synk): single-buffer them (pipeline_mode=pl.Buffered(1)) when scaling to real
    #             widths where the doubled w2b/w1b buffers pressure v7x's 64 MiB VMEM.
    kernel = functools.partial(_dense_layer_fused_kernel, img_h=H)
    out_rows = pl.pallas_call(
        kernel,
        out_shape=jax.ShapeDtypeStruct((N * H, WCi), jnp.float32),
        grid=(num_blocks,),
        in_specs=[
            pl.BlockSpec((block_rows, WCi), lambda i: (i, 0)),    # x rows (whole images)
            pl.BlockSpec((1, WCi), lambda i: (0, 0)),             # BN1 scale (W-tiled)
            pl.BlockSpec((1, WCi), lambda i: (0, 0)),             # BN1 shift
            pl.BlockSpec((WCi, WCm), lambda i: (0, 0)),           # 1x1 weight (block-diag, bf16)
            pl.BlockSpec((1, WCm), lambda i: (0, 0)),             # BN2 shift (W-tiled)
            pl.BlockSpec((3, WCm, WCi), lambda i: (0, 0, 0)),     # 3x3 banded weight (bf16)
        ],
        out_specs=pl.BlockSpec((block_rows, WCi), lambda i: (i, 0)),
        compiler_params=pltpu.CompilerParams(
            dimension_semantics=("parallel",),      # row blocks are independent
            vmem_limit_bytes=32 * 1024 * 1024),     # explicit budget (v7x: 64 MiB physical)
    )(x_rows, packed["s1_row"], packed["b1_row"], packed["w1b"],
      packed["b2_row"], packed["w2b"])

    out_nhwc = out_rows.reshape(N, H, W, Cin)
    return jnp.transpose(out_nhwc, (0, 3, 1, 2))    # back to NCHW


# ----------------------------------------------------------------------------
# Pure-JAX reference (same bf16-operand / f32-accumulation contract as the kernel)
# ----------------------------------------------------------------------------
def reference_forward(x_nchw, params, group_3x3):
    x = jnp.transpose(x_nchw, (0, 2, 3, 1)).astype(jnp.float32)     # NHWC
    a = jnp.maximum(x * params["s1"] + params["b1"], 0.0)
    w1s = (params["w1_mat"] * params["s2"][None, :]).astype(jnp.bfloat16)
    h = jnp.einsum("nhwc,cm->nhwm", a.astype(jnp.bfloat16), w1s,
                   preferred_element_type=jnp.float32)
    h = jnp.maximum(h + params["b2"], 0.0)
    w2_hwio = jnp.transpose(params["w2"], (2, 3, 1, 0)).astype(jnp.bfloat16)  # (3,3,Cmid/G,Cin)
    conv = jax.lax.conv_general_dilated(
        h.astype(jnp.bfloat16), w2_hwio, window_strides=(1, 1), padding=((1, 1), (1, 1)),
        dimension_numbers=("NHWC", "HWIO", "NHWC"),
        feature_group_count=group_3x3,
        preferred_element_type=jnp.float32)
    out = conv + x
    return jnp.transpose(out, (0, 3, 1, 2))


if __name__ == "__main__":
    # args-equivalents: bottleneck=4, group_1x1=2, group_3x3=2, condense_factor=2, dropout=0
    N, in_channels, H, W = 2, 8, 8, 8
    growth_rate, bottleneck = 4, 4
    group_3x3 = 2
    # group_1x1 / condense_factor only drive the training-time condensation mask, which is
    # all-ones right after __init__; dropout (eval / rate 0) is identity.
    # TODO(synk): LearnedGroupConv's training-time mask update (_check_drop) is not a forward op.

    key = jax.random.PRNGKey(0)
    k_param, k_x = jax.random.split(key)
    params = init_dense_layer_params(k_param, in_channels, growth_rate, bottleneck, group_3x3)
    packed = pack_dense_layer_params(params, H, W)
    x = jax.random.normal(k_x, (N, in_channels, H, W), jnp.float32)

    fwd = jax.jit(dense_layer_forward)
    out = jax.block_until_ready(fwd(x, packed))

    ref = reference_forward(x, params, group_3x3)
    assert out.shape == x.shape, (out.shape, x.shape)
    if not jnp.allclose(out, ref, atol=1e-2, rtol=1e-2):
        max_err = float(jnp.max(jnp.abs(out - ref)))
        raise AssertionError(f"Pallas output does not match reference (max abs err {max_err})")
    print("KERNEL_OK")
</pallas_src>

<mosaic_0001>
module attributes {stable_mosaic.version = 11 : i64} {
  func.func @_dense_layer_fused_kernel(%arg0: i32, %arg1: memref<16x64xf32, #tpu.memory_space<vmem>>, %arg2: memref<1x64xf32, #tpu.memory_space<vmem>>, %arg3: memref<1x64xf32, #tpu.memory_space<vmem>>, %arg4: memref<64x128xbf16, #tpu.memory_space<vmem>>, %arg5: memref<1x128xf32, #tpu.memory_space<vmem>>, %arg6: memref<3x128x64xbf16, #tpu.memory_space<vmem>>, %arg7: memref<16x64xf32, #tpu.memory_space<vmem>>) attributes {dimension_semantics = [#tpu.dimension_semantics<parallel>], iteration_bounds = array<i64: 1>, scalar_prefetch = 0 : i64, scratch_operands = 0 : i64, tpu.core_type = #tpu.core_type<tc>, window_params = [{transform_indices = @transform_0, window_bounds = array<i64: 16, 64>}, {pipeline_mode = #tpu.pipeline_mode<synchronous>, transform_indices = @transform_1, window_bounds = array<i64: 1, 64>}, {pipeline_mode = #tpu.pipeline_mode<synchronous>, transform_indices = @transform_2, window_bounds = array<i64: 1, 64>}, {pipeline_mode = #tpu.pipeline_mode<synchronous>, transform_indices = @transform_3, window_bounds = array<i64: 64, 128>}, {pipeline_mode = #tpu.pipeline_mode<synchronous>, transform_indices = @transform_4, window_bounds = array<i64: 1, 128>}, {pipeline_mode = #tpu.pipeline_mode<synchronous>, transform_indices = @transform_5, window_bounds = array<i64: 3, 128, 64>}, {transform_indices = @transform_6, window_bounds = array<i64: 16, 64>}]} {
    %c0 = arith.constant 0 : index
    %c0_0 = arith.constant 0 : index
    %0 = vector.load %arg1[%c0, %c0_0] : memref<16x64xf32, #tpu.memory_space<vmem>>, vector<16x64xf32>
    %c0_1 = arith.constant 0 : index
    %c0_2 = arith.constant 0 : index
    %1 = vector.load %arg2[%c0_1, %c0_2] : memref<1x64xf32, #tpu.memory_space<vmem>>, vector<1x64xf32>
    %2 = vector.broadcast %1 : vector<1x64xf32> to vector<16x64xf32>
    %3 = arith.mulf %0, %2 : vector<16x64xf32>
    %c0_3 = arith.constant 0 : index
    %c0_4 = arith.constant 0 : index
    %4 = vector.load %arg3[%c0_3, %c0_4] : memref<1x64xf32, #tpu.memory_space<vmem>>, vector<1x64xf32>
    %5 = vector.broadcast %4 : vector<1x64xf32> to vector<16x64xf32>
    %6 = arith.addf %3, %5 : vector<16x64xf32>
    %cst = arith.constant 0.000000e+00 : f32
    %7 = vector.broadcast %cst : f32 to vector<16x64xf32>
    %8 = arith.maximumf %6, %7 : vector<16x64xf32>
    %9 = arith.truncf %8 : vector<16x64xf32> to vector<16x64xbf16>
    %c0_5 = arith.constant 0 : index
    %c0_6 = arith.constant 0 : index
    %10 = vector.load %arg4[%c0_5, %c0_6] : memref<64x128xbf16, #tpu.memory_space<vmem>>, vector<64x128xbf16>
    %cst_7 = arith.constant dense<0.000000e+00> : vector<16x128xf32>
    %11 = tpu.matmul %9, %10, %cst_7 {dimension_numbers = #tpu.dot_dimension_numbers<[1], [0], [0], [1], [0, 0, 1, 1], [], []>} : vector<16x64xbf16>, vector<64x128xbf16>, vector<16x128xf32> -> vector<16x128xf32>
    %c0_8 = arith.constant 0 : index
    %c0_9 = arith.constant 0 : index
    %12 = vector.load %arg5[%c0_8, %c0_9] : memref<1x128xf32, #tpu.memory_space<vmem>>, vector<1x128xf32>
    %13 = vector.broadcast %12 : vector<1x128xf32> to vector<16x128xf32>
    %14 = arith.addf %11, %13 : vector<16x128xf32>
    %cst_10 = arith.constant 0.000000e+00 : f32
    %15 = vector.broadcast %cst_10 : f32 to vector<16x128xf32>
    %16 = arith.maximumf %14, %15 : vector<16x128xf32>
    %17 = tpu.iota {dimensions = array<i32: 0>} : vector<16x128xi32>
    %c8_i32 = arith.constant 8 : i32
    %c0_i32 = arith.constant 0 : i32
    %18 = arith.cmpi eq, %c8_i32, %c0_i32 : i32
    %c1_i32 = arith.constant 1 : i32
    %19 = arith.select %18, %c1_i32, %c8_i32 : i32
    %20 = vector.broadcast %19 : i32 to vector<16x128xi32>
    %21 = arith.remsi %17, %20 : vector<16x128xi32>
    %c0_i32_11 = arith.constant 0 : i32
    %22 = vector.broadcast %c0_i32_11 : i32 to vector<16x128xi32>
    %23 = arith.cmpi ne, %21, %22 : vector<16x128xi32>
    %c0_i32_12 = arith.constant 0 : i32
    %24 = vector.broadcast %c0_i32_12 : i32 to vector<16x128xi32>
    %25 = arith.cmpi slt, %21, %24 : vector<16x128xi32>
    %c0_i32_13 = arith.constant 0 : i32
    %26 = arith.cmpi slt, %19, %c0_i32_13 : i32
    %27 = vector.broadcast %26 : i1 to vector<16x128xi1>
    %28 = vector.broadcast %27 : vector<16x128xi1> to vector<16x128xi1>
    %29 = arith.xori %25, %28 : vector<16x128xi1>
    %30 = arith.andi %29, %23 : vector<16x128xi1>
    %31 = vector.broadcast %19 : i32 to vector<16x128xi32>
    %32 = arith.addi %21, %31 : vector<16x128xi32>
    %33 = arith.select %30, %32, %21 : vector<16x128xi1>, vector<16x128xi32>
    %c0_i32_14 = arith.constant 0 : i32
    %34 = vector.broadcast %c0_i32_14 : i32 to vector<16x128xi32>
    %35 = arith.cmpi eq, %33, %34 : vector<16x128xi32>
    %c1_i32_15 = arith.constant 1 : i32
    %36 = tpu.dynamic_rotate %16 by %c1_i32_15 dim 0 : vector<16x128xf32>, i32 -> vector<16x128xf32>
    %cst_16 = arith.constant 0.000000e+00 : f32
    %37 = vector.broadcast %cst_16 : f32 to vector<16x128xf32>
    %38 = arith.select %35, %37, %36 : vector<16x128xi1>, vector<16x128xf32>
    %c7_i32 = arith.constant 7 : i32
    %39 = vector.broadcast %c7_i32 : i32 to vector<16x128xi32>
    %40 = arith.cmpi eq, %33, %39 : vector<16x128xi32>
    %c15_i32 = arith.constant 15 : i32
    %41 = tpu.dynamic_rotate %16 by %c15_i32 dim 0 : vector<16x128xf32>, i32 -> vector<16x128xf32>
    %cst_17 = arith.constant 0.000000e+00 : f32
    %42 = vector.broadcast %cst_17 : f32 to vector<16x128xf32>
    %43 = arith.select %40, %42, %41 : vector<16x128xi1>, vector<16x128xf32>
    %44 = arith.truncf %38 : vector<16x128xf32> to vector<16x128xbf16>
    %c0_18 = arith.constant 0 : index
    %c0_19 = arith.constant 0 : index
    %c0_20 = arith.constant 0 : index
    %45 = vector.load %arg6[%c0_18, %c0_19, %c0_20] : memref<3x128x64xbf16, #tpu.memory_space<vmem>>, vector<1x128x64xbf16>
    %46 = vector.shape_cast %45 : vector<1x128x64xbf16> to vector<128x64xbf16>
    %cst_21 = arith.constant dense<0.000000e+00> : vector<16x64xf32>
    %47 = tpu.matmul %44, %46, %cst_21 {dimension_numbers = #tpu.dot_dimension_numbers<[1], [0], [0], [1], [0, 0, 1, 1], [], []>} : vector<16x128xbf16>, vector<128x64xbf16>, vector<16x64xf32> -> vector<16x64xf32>
    %48 = arith.truncf %16 : vector<16x128xf32> to vector<16x128xbf16>
    %c1 = arith.constant 1 : index
    %c0_22 = arith.constant 0 : index
    %c0_23 = arith.constant 0 : index
    %49 = vector.load %arg6[%c1, %c0_22, %c0_23] : memref<3x128x64xbf16, #tpu.memory_space<vmem>>, vector<1x128x64xbf16>
    %50 = vector.shape_cast %49 : vector<1x128x64xbf16> to vector<128x64xbf16>
    %cst_24 = arith.constant dense<0.000000e+00> : vector<16x64xf32>
    %51 = tpu.matmul %48, %50, %cst_24 {dimension_numbers = #tpu.dot_dimension_numbers<[1], [0], [0], [1], [0, 0, 1, 1], [], []>} : vector<16x128xbf16>, vector<128x64xbf16>, vector<16x64xf32> -> vector<16x64xf32>
    %52 = arith.addf %47, %51 : vector<16x64xf32>
    %53 = arith.truncf %43 : vector<16x128xf32> to vector<16x128xbf16>
    %c2 = arith.constant 2 : index
    %c0_25 = arith.constant 0 : index
    %c0_26 = arith.constant 0 : index
    %54 = vector.load %arg6[%c2, %c0_25, %c0_26] : memref<3x128x64xbf16, #tpu.memory_space<vmem>>, vector<1x128x64xbf16>
    %55 = vector.shape_cast %54 : vector<1x128x64xbf16> to vector<128x64xbf16>
    %cst_27 = arith.constant dense<0.000000e+00> : vector<16x64xf32>
    %56 = tpu.matmul %53, %55, %cst_27 {dimension_numbers = #tpu.dot_dimension_numbers<[1], [0], [0], [1], [0, 0, 1, 1], [], []>} : vector<16x128xbf16>, vector<128x64xbf16>, vector<16x64xf32> -> vector<16x64xf32>
    %57 = arith.addf %52, %56 : vector<16x64xf32>
    %58 = arith.addf %57, %0 : vector<16x64xf32>
    %c0_28 = arith.constant 0 : index
    %c0_29 = arith.constant 0 : index
    %59 = vector.load %arg7[%c0_28, %c0_29] : memref<16x64xf32, #tpu.memory_space<vmem>>, vector<16x64xf32>
    tpu.vector_store %arg7[%c0_28, %c0_29], %58 {strides = array<i32>} : memref<16x64xf32, #tpu.memory_space<vmem>>, vector<16x64xf32>,
    return
  }
  func.func @transform_0(%arg0: i32) -> (i32, i32) {
    %c0_i32 = arith.constant 0 : i32
    %c0_i32_0 = arith.constant 0 : i32
    return %arg0, %c0_i32 : i32, i32
  }
  func.func @transform_1(%arg0: i32) -> (i32, i32) {
    %c0_i32 = arith.constant 0 : i32
    %c0_i32_0 = arith.constant 0 : i32
    %c0_i32_1 = arith.constant 0 : i32
    return %c0_i32, %c0_i32_0 : i32, i32
  }
  func.func @transform_2(%arg0: i32) -> (i32, i32) {
    %c0_i32 = arith.constant 0 : i32
    %c0_i32_0 = arith.constant 0 : i32
    %c0_i32_1 = arith.constant 0 : i32
    return %c0_i32, %c0_i32_0 : i32, i32
  }
  func.func @transform_3(%arg0: i32) -> (i32, i32) {
    %c0_i32 = arith.constant 0 : i32
    %c0_i32_0 = arith.constant 0 : i32
    %c0_i32_1 = arith.constant 0 : i32
    return %c0_i32, %c0_i32_0 : i32, i32
  }
  func.func @transform_4(%arg0: i32) -> (i32, i32) {
    %c0_i32 = arith.constant 0 : i32
    %c0_i32_0 = arith.constant 0 : i32
    %c0_i32_1 = arith.constant 0 : i32
    return %c0_i32, %c0_i32_0 : i32, i32
  }
  func.func @transform_5(%arg0: i32) -> (i32, i32, i32) {
    %c0_i32 = arith.constant 0 : i32
    %c0_i32_0 = arith.constant 0 : i32
    %c0_i32_1 = arith.constant 0 : i32
    %c0_i32_2 = arith.constant 0 : i32
    return %c0_i32, %c0_i32_0, %c0_i32_1 : i32, i32, i32
  }
  func.func @transform_6(%arg0: i32) -> (i32, i32) {
    %c0_i32 = arith.constant 0 : i32
    %c0_i32_0 = arith.constant 0 : i32
    return %arg0, %c0_i32 : i32, i32
  }
}

</mosaic_0001>

<bundles_post_ra>
// kernel: dense_layer_forward.1
= control target key start
LH: loop header
LB: loop body
LE: loop exit
PB: predicated region body
PF: predicated region fallthrough
CT: control target
= control target key end

     0   :  { %v720_v0 = vmov 0.0   ;;  %vm721_vm0 = vmmov 0   ;;  %vm86_vm1 = vcmask 523264   ;;  %v133_v32 = vlaneseq  ;;  %s921_s3 = inlined_call_operand.vmem [shape: bf16[64,128], index: 3, kind: input, shape index: {}]   ;;  %s922_s0 = inlined_call_operand.vmem [shape: f32[16,64], index: 0, kind: input, shape index: {}]   ;;  %s923_s1 = inlined_call_operand.vmem [shape: f32[1,64], index: 1, kind: input, shape index: {}]   ;;  %s924_s2 = inlined_call_operand.vmem [shape: f32[1,64], index: 2, kind: input, shape index: {}]   ;;  %s925_s5 = inlined_call_operand.vmem [shape: bf16[3,128,64], index: 5, kind: input, shape index: {}]   ;;  %s926_s4 = inlined_call_operand.vmem [shape: f32[1,128], index: 4, kind: input, shape index: {}]   ;;  %s927_s6 = inlined_call_operand.vmem [shape: f32[16,64], index: 6, kind: output, shape index: {}]  }
   0x1   :  { %618 = vmatprep.subr.bf16.mxu0 %v720_v0  ;;  %v692_v1 = vld [vmem:[%s921_s3] sm:$0xff]   ;;  %626 = vmatprep.mubr.msk.bf16.mxu0 %vm721_vm0, %v720_v0  ;;  %v693_v2 = vld [vmem:[%s921_s3 + $0x8] sm:$0xff]   ;;  %v694_v3 = vld [vmem:[%s921_s3 + $0x10] sm:$0xff]  }
   0x2   :  { %630 = vmatprep.subr.bf16.mxu1 %v720_v0  ;;  %646 = vmatprep.mubr.msk.bf16.mxu1 %vm721_vm0, %v720_v0  ;;  %v776_v4 = vld [vmem:[%s922_s0] sm:$0xff]  ;;  %v781_v5 = vld [vmem:[%s922_s0 + $0x8] sm:$0xff]  ;;  %v695_v14 = vld [vmem:[%s921_s3 + $0x18] sm:$0xff]   ;;  %v134_v33 = vshrl.u32 %v133_v32, 7 }
   0x3   :  { %619 = vmatpush3.bf16.msra.mxu0 %v692_v1  ;;  %v508_v6 = vld [vmem:[%s923_s1] ss:$0 sm:$0xff]  ;;  %v697_v13 = vld [vmem:[%s925_s5 + $0x48] sm:$0xff]   ;;  %v699_v17 = vld [vmem:[%s925_s5 + $0x50] sm:$0xff]  }
   0x4   :  { %620 = vmatprep.subr.bf16.mxu0 %v720_v0  ;;  %v33_v7 = vmul.f32 %v508_v6, %v776_v4  ;;  %v34_v8 = vmul.f32 %v508_v6, %v781_v5  ;;  %v509_v9 = vld [vmem:[%s924_s2] ss:$0 sm:$0xff]  ;;  %v700_v20 = vld [vmem:[%s925_s5 + $0x8] sm:$0xff]   ;;  %v701_v21 = vld [vmem:[%s925_s5 + $0x58] sm:$0xff]   ;;  %v135_v35 = vadd.s32 8, %v134_v33  ;;  %v140_v40 = vand.u32 7, %v134_v33 }
   0x5   :  { %v696_v10 = vld [vmem:[%s925_s5 + $0x40] sm:$0xff]   ;;  %v702_v23 = vld [vmem:[%s925_s5 + $0x10] sm:$0xff]   ;;  %v705_v24 = vld [vmem:[%s925_s5 + $0x68] sm:$0xff]   ;;  %vm164_vm2 = vcmp.lt.s32.totalorder %v134_v33, 1  ;;  %vm173_vm3 = vcmp.lt.s32.totalorder %v134_v33, 7 }
   0x6   :  { %v42_v11 = vadd.f32 %v509_v9, %v33_v7  ;;  %v43_v12 = vadd.f32 %v509_v9, %v34_v8  ;;  %631 = vmatpush3.bf16.msra.mxu1 %v696_v10  ;;  %v698_v19 = vld [vmem:[%s925_s5] sm:$0xff]   ;;  %v704_v25 = vld [vmem:[%s925_s5 + $0x18] sm:$0xff]   ;;  %v707_v27 = vld [vmem:[%s925_s5 + $0x70] sm:$0xff]   ;;  %v147_v41 = vand.u32 7, %v135_v35  ;;  %vm873_vm5 = vcmp.ne.s32.totalorder %v140_v40, 0 }
   0x7   :  { %621 = vmatpush3.bf16.msra.mxu0 %v693_v2  ;;  %632 = vmatprep.subr.bf16.mxu1 %v720_v0  ;;  %v703_v22 = vld [vmem:[%s925_s5 + $0x60] sm:$0xff]   ;;  %v708_v28 = vld [vmem:[%s925_s5 + $0x28] sm:$0xff]   ;;  %v709_v29 = vld [vmem:[%s925_s5 + $0x78] sm:$0xff]   ;;  %vm585_vm8 = vcmp.ne.s32.totalorder %v140_v40, 7 }
   0x8   :  { %622 = vmatprep.subr.bf16.mxu0 %v720_v0  ;;  %v44_v15 = vmax.f32 %v42_v11, 0.0  ;;  %v45_v16 = vmax.f32 %v43_v12, 0.0  ;;  %v706_v26 = vld [vmem:[%s925_s5 + $0x20] sm:$0xff]   ;;  %v710_v30 = vld [vmem:[%s925_s5 + $0x30] sm:$0xff]   ;;  %v711_v31 = vld [vmem:[%s925_s5 + $0x38] sm:$0xff]   ;;  %vm869_vm4 = vcmp.ne.s32.totalorder %v147_v41, 0 }
   0x9   :  { %v510_v34 = vld [vmem:[%s926_s4] ss:$0 sm:$0xff]  ;;  %vm550_vm6 = vmpackc.low %vm869_vm4, %vm873_vm5  ;;  %v713_v60 = vld [vmem:[%s925_s5 + $0x88] sm:$0xff]   ;;  %vm584_vm7 = vcmp.ne.s32.totalorder %v147_v41, 7 }
   0xa   :  { %633 = vmatpush3.bf16.msra.mxu1 %v697_v13  ;;  %v46_v18 = vpack.c.bf16 %v45_v16, %v44_v15  ;;  %v712_v47 = vld [vmem:[%s925_s5 + $0x80] sm:$0xff]   ;;  %v714_v61 = vld [vmem:[%s925_s5 + $0x90] sm:$0xff]   ;;  %v715_v62 = vld [vmem:[%s925_s5 + $0x98] sm:$0xff]  }
   0xb   :  { %623 = vmatpush3.bf16.msra.mxu0 %v694_v3  ;;  %634 = vmatprep.subr.bf16.mxu1 %v720_v0  ;;  %v716_v63 = vld [vmem:[%s925_s5 + $0xa0] sm:$0xff]   ;;  %v717_v1 = vld [vmem:[%s925_s5 + $0xa8] sm:$0xff]   ;;  %v718_v2 = vld [vmem:[%s925_s5 + $0xb0] sm:$0xff]  }
   0xc   :  { %624 = vmatprep.subr.bf16.mxu0 %v720_v0  ;;  %v719_v3 = vld [vmem:[%s925_s5 + $0xb8] sm:$0xff]   ;;  %vm579_vm9 = vmpackc.low %vm584_vm7, %vm585_vm8 }
   0xe   :  { %635 = vmatpush3.bf16.msra.mxu1 %v699_v17 }
   0xf   :  { %625 = vmatpush3.bf16.msra.mxu0 %v695_v14  ;;  %636 = vmatprep.subr.bf16.mxu1 %v720_v0 }
  0x10   :  { %650 = vmatprep.subr.bf16.mxu0 %v720_v0 }
  0x12   :  { %627 = vmatmul.mubr.msk.bf16.vlgmr.msra.gmra.mrb[0].mxu0 %vm86_vm1, %v46_v18  ;;  %637 = vmatpush3.bf16.msra.mxu1 %v701_v21 }
  0x13   :  { %651 = vmatpush3.bf16.msra.mxu0 %v698_v19  ;;  %666 = vmatprep.mubr.msk.bf16.mxu0 %vm721_vm0, %v720_v0 }
  0x14   :  { %652 = vmatprep.subr.bf16.mxu0 %v720_v0  ;;  %638 = vmatprep.subr.bf16.mxu1 %v720_v0 }
  0x16   :  { %639 = vmatpush3.bf16.msra.mxu1 %v703_v22 }
  0x17   :  { %653 = vmatpush3.bf16.msra.mxu0 %v700_v20  ;;  %640 = vmatprep.subr.bf16.mxu1 %v720_v0 }
  0x18   :  { %654 = vmatprep.subr.bf16.mxu0 %v720_v0 }
  0x1a   :  { %641 = vmatpush3.bf16.msra.mxu1 %v705_v24 }
  0x1b   :  { %655 = vmatpush3.bf16.msra.mxu0 %v702_v23  ;;  %642 = vmatprep.subr.bf16.mxu1 %v720_v0 }
  0x1c   :  { %656 = vmatprep.subr.bf16.mxu0 %v720_v0 }
  0x1e   :  { %643 = vmatpush3.bf16.msra.mxu1 %v707_v27 }
  0x1f   :  { %657 = vmatpush3.bf16.msra.mxu0 %v704_v25  ;;  %644 = vmatprep.subr.bf16.mxu1 %v720_v0 }
  0x20   :  { %658 = vmatprep.subr.bf16.mxu0 %v720_v0 }
  0x22   :  { %645 = vmatpush3.bf16.msra.mxu1 %v709_v29 }
  0x23   :  { %659 = vmatpush3.bf16.msra.mxu0 %v706_v26  ;;  %670 = vmatprep.subr.bf16.mxu1 %v720_v0 }
  0x24   :  { %660 = vmatprep.subr.bf16.mxu0 %v720_v0 }
  0x27   :  { %661 = vmatpush3.bf16.msra.mxu0 %v708_v28 }
  0x28   :  { %662 = vmatprep.subr.bf16.mxu0 %v720_v0 }
  0x2b   :  { %663 = vmatpush3.bf16.msra.mxu0 %v710_v30 }
  0x2c   :  { %664 = vmatprep.subr.bf16.mxu0 %v720_v0 }
  0x2f   :  { %665 = vmatpush3.bf16.msra.mxu0 %v711_v31 }
  0xe5   :  { %v124_v36 = vpop.f32.mrb[0].mxu0 }
  0xe6   :  { %v125_v37 = vadd.f32 %v510_v34, %v124_v36  ;;  %v628_v38 = vpop.f32.mrb[1].mxu0 }
  0xe7   :  { %v127_v39 = vpop.f32.mrb[2].mxu0 }
  0xe8   :  { %v131_v42 = vmax.f32 %v125_v37, 0.0  ;;  %v128_v43 = vadd.f32 %v510_v34, %v127_v39  ;;  %v629_v44 = vpop.f32.mrb[3].mxu0 }
  0xea   :  { %v132_v45 = vmax.f32 %v128_v43, 0.0  ;;  %v162_v46 = vrot.slane %v131_v42, 7  ;;  %v171_v50 = vrot.slane %v131_v42, 1 }
  0xec   :  { %v163_v51 = vrot.slane %v132_v45, 7  ;;  %v172_v52 = vrot.slane %v132_v45, 1  ;;  %v195_v53 = vpack.c.bf16 %v132_v45, %v131_v42 }
  0xee   :  { %v165_v54 = vsel %vm164_vm2, %v162_v46, %v163_v51  ;;  %v166_v55 = vsel %vm164_vm2, %v163_v51, %v162_v46  ;;  %v174_v56 = vsel %vm173_vm3, %v171_v50, %v172_v52  ;;  %v175_v57 = vsel %vm173_vm3, %v172_v52, %v171_v50  ;;  %647 = vmatmul.mubr.bf16.vlgmr.msra.gmra.mrb[0].mxu1 %v195_v53 }
  0xef   :  { %v551_v58 = vpack.c.bf16 %v165_v54, %v166_v55  ;;  %v580_v59 = vpack.c.bf16 %v175_v57, %v174_v56  ;;  %671 = vmatpush3.bf16.msra.mxu1 %v712_v47  ;;  %686 = vmatprep.mubr.msk.bf16.mxu1 %vm721_vm0, %v720_v0 }
  0xf0   :  { %672 = vmatprep.subr.bf16.mxu1 %v720_v0 }
  0xf1   :  { %667 = vmatmul.mubr.msk.bf16.vlgmr.msra.gmra.mrb[4].mxu0 %vm550_vm6, %v551_v58 }
  0xf3   :  { %673 = vmatpush3.bf16.msra.mxu1 %v713_v60 }
  0xf4   :  { %674 = vmatprep.subr.bf16.mxu1 %v720_v0 }
  0xf7   :  { %675 = vmatpush3.bf16.msra.mxu1 %v714_v61 }
  0xf8   :  { %676 = vmatprep.subr.bf16.mxu1 %v720_v0 }
  0xfb   :  { %677 = vmatpush3.bf16.msra.mxu1 %v715_v62 }
  0xfc   :  { %678 = vmatprep.subr.bf16.mxu1 %v720_v0 }
  0xff   :  { %679 = vmatpush3.bf16.msra.mxu1 %v716_v63 }
 0x100   :  { %680 = vmatprep.subr.bf16.mxu1 %v720_v0 }
 0x103   :  { %681 = vmatpush3.bf16.msra.mxu1 %v717_v1 }
 0x104   :  { %682 = vmatprep.subr.bf16.mxu1 %v720_v0 }
 0x107   :  { %683 = vmatpush3.bf16.msra.mxu1 %v718_v2 }
 0x108   :  { %684 = vmatprep.subr.bf16.mxu1 %v720_v0 }
 0x10b   :  { %685 = vmatpush3.bf16.msra.mxu1 %v719_v3 }
 0x10e   :  { %687 = vmatmul.mubr.msk.bf16.vlgmr.msra.gmra.mrb[4].mxu1 %vm579_vm9, %v580_v59 }
 0x1c1   :  { %v295_v6 = vpop.f32.mrb[0].mxu1 }
 0x1c2   :  { %v648_v7 = vpop.f32.mrb[1].mxu1 }
 0x1c3   :  { %v298_v8 = vpop.f32.mrb[2].mxu1 }
 0x1c4   :  { %v649_v9 = vpop.f32.mrb[3].mxu1  ;;  %v384_v10 = vpop.f32.mrb[4].mxu0 }
 0x1c5   :  { %v385_v11 = vadd.f32 %v384_v10, %v295_v6  ;;  %v668_v12 = vpop.f32.mrb[5].mxu0 }
 0x1c6   :  { %v387_v13 = vpop.f32.mrb[6].mxu0 }
 0x1c7   :  { %v388_v14 = vadd.f32 %v387_v13, %v298_v8  ;;  %v669_v15 = vpop.f32.mrb[7].mxu0 }
 0x1e1   :  { %v491_v16 = vpop.f32.mrb[4].mxu1 }
 0x1e2   :  { %v498_v17 = vadd.f32 %v491_v16, %v385_v11  ;;  %v688_v18 = vpop.f32.mrb[5].mxu1 }
 0x1e3   :  { %v494_v19 = vpop.f32.mrb[6].mxu1 }
 0x1e4   :  { %v500_v0 = vadd.f32 %v498_v17, %v776_v4  ;;  %v499_v20 = vadd.f32 %v494_v19, %v388_v14  ;;  %v689_v21 = vpop.f32.mrb[7].mxu1 }
 0x1e6   :  { %502 = vst.msk [vmem:[%s927_s6] sm:$0xff] %vm86_vm1, %v500_v0  ;;  %v501_v22 = vadd.f32 %v499_v20, %v781_v5 }
 0x1e8   :  { %503 = vst.msk [vmem:[%s927_s6 + $0x8] sm:$0xff] %vm86_vm1, %v501_v22 }

</bundles_post_ra>
